<compile_context>
chip_gen: v7x
topology: tpu7x:2x2x1
jax: 0.10.0
libtpu: 0.0.40
codegen_flags: <defaults>
</compile_context>

<pallas_src>
import numpy as np
import jax
import jax.numpy as jnp
from jax.experimental import pallas as pl
from jax.experimental.pallas import tpu as pltpu

_BN_EPS = 1e-5


def _vmem_spec():
    return pl.BlockSpec(memory_space=pltpu.MemorySpace.VMEM)


# ----------------------------------------------------------------------------
# Fused Pallas kernel: all DeconvBlocks + final Linear + ReLU
# ----------------------------------------------------------------------------
def _make_decoder_kernel(n_blocks):
    """Build the fused decoder kernel for a static number of blocks.

    Ref layout (all full-array VMEM blocks, tiny shapes):
      x_ref                                [B, L0*C0]          f32
      per block i: a, bias_f, gamma, beta, g, gt
          a       [Lin*Cin, Lup*Cout]  bf16  fused upsample+convT operator
          bias_f  [1, Lup*Cout]        f32   conv bias tiled over positions
          gamma   [1, Cout]            f32
          beta    [1, Cout]            f32
          g       [Lup*Cout, Cout]     f32   0/1 channel-group sum matrix
          gt      [Cout, Lup*Cout]     f32   tile-back (G^T)
      lin_w_ref   [Lf*Clast, Lf*Cf]    bf16  kron(I_Lf, W_linear)
      lin_b_ref   [1, Lf*Cf]           f32
      o_ref       [B, Lf*Cf]           f32
    """

    def kernel(*refs):
        x_ref = refs[0]
        o_ref = refs[-1]
        lin_w_ref = refs[1 + 6 * n_blocks]
        lin_b_ref = refs[2 + 6 * n_blocks]

        batch = x_ref.shape[0]
        h = x_ref[...].astype(jnp.bfloat16)                 # [B, L*C]

        for i in range(n_blocks):                           # static, unrolled
            a_ref, bias_ref, gamma_ref, beta_ref, g_ref, gt_ref = \
                refs[1 + 6 * i: 7 + 6 * i]

            # Upsample + ConvTranspose1d: one MXU matmul for the whole batch.
            pre = jnp.dot(h, a_ref[...],
                          preferred_element_type=jnp.float32) + bias_ref[...]

            # BatchNorm1d, training-mode batch stats over (batch, length),
            # computed per channel on the flat layout via the group matrix G.
            cout = g_ref.shape[1]
            lup = a_ref.shape[1] // cout
            inv_n = 1.0 / (batch * lup)
            ps = jnp.dot(pre, g_ref[...],
                         preferred_element_type=jnp.float32)        # [B, Cout]
            ps2 = jnp.dot(pre * pre, g_ref[...],
                          preferred_element_type=jnp.float32)       # [B, Cout]
            mean = jnp.sum(ps, axis=0, keepdims=True) * inv_n       # [1, Cout]
            ex2 = jnp.sum(ps2, axis=0, keepdims=True) * inv_n
            var = ex2 - mean * mean                                 # biased var
            scale = gamma_ref[...] * jax.lax.rsqrt(var + _BN_EPS)
            shift = beta_ref[...] - mean * scale
            scale_f = jnp.dot(scale, gt_ref[...],
                              preferred_element_type=jnp.float32)   # [1, Lup*Cout]
            shift_f = jnp.dot(shift, gt_ref[...],
                              preferred_element_type=jnp.float32)

            # Normalize + ReLU; feed next block in bf16 for the MXU.
            h = jnp.maximum(pre * scale_f + shift_f, 0.0).astype(jnp.bfloat16)

        # Final nn.Linear + ReLU in the same flat layout; single lane-dense
        # store of the whole output slab.
        out = jnp.dot(h, lin_w_ref[...],
                      preferred_element_type=jnp.float32) + lin_b_ref[...]
        o_ref[...] = jnp.maximum(out, 0.0)

    return kernel


# ----------------------------------------------------------------------------
# Host-side operator folding (plain NumPy, done once per parameter set)
# ----------------------------------------------------------------------------
def _upsample_matrix(l_in, scale):
    """nn.Upsample(scale_factor=scale, mode='linear', align_corners=True)."""
    l_out = int(l_in * scale)
    u = np.zeros((l_out, l_in), np.float32)
    if l_in == 1 or l_out == 1:
        u[:, 0] = 1.0
        return u
    for lo in range(l_out):
        pos = lo * (l_in - 1) / (l_out - 1)
        i0 = int(np.floor(pos))
        frac = pos - i0
        i1 = min(i0 + 1, l_in - 1)
        u[lo, i0] += 1.0 - frac
        u[lo, i1] += frac
    return u


def _block_operator(u, w):
    """Fused Upsample+ConvTranspose1d operator A so that y_flat = x_flat @ A.

    u: [Lup, Lin] upsample matrix.
    w: torch-style ConvTranspose1d weight [Cin, Cout, ks].
    Valid for odd ks with padding=(ks-1)//2 (output length == Lup).
    """
    lup, lin = u.shape
    cin, cout, ks = w.shape
    # TODO(synk): even kernel_size changes the ConvTranspose1d output length
    # (Lup + 1); only the odd-ks / padding=(ks-1)//2 case is folded here.
    assert ks % 2 == 1, "only odd kernel_size supported"
    pad = (ks - 1) // 2
    q = ks - 1 - pad
    m = np.zeros((ks, lup, lin), np.float32)        # M_k = S_k @ U
    for k in range(ks):
        off = k - q
        lo, hi = max(0, -off), min(lup, lup - off)
        if hi > lo:
            m[k, lo:hi, :] = u[lo + off:hi + off, :]
    wf = np.transpose(w[:, :, ::-1], (2, 0, 1))     # [ks, Cin, Cout], flipped
    # A[(l, i), (u, o)] = sum_k M_k[u, l] * Wf_k[i, o]
    return np.einsum('kul,kio->liuo', m, wf).reshape(lin * cin, lup * cout)


def _build_operands(x_shape, params):
    """Fold all block / linear operators; returns pallas operands + out dims."""
    _, l, _ = x_shape
    operands = []
    for blk in params["blocks"]:
        w = np.asarray(blk["w"], np.float32)                 # [Cin, Cout, ks]
        cout = w.shape[1]
        u = _upsample_matrix(l, int(blk["pks"]))
        lup = u.shape[0]
        a = _block_operator(u, w)                            # [Lin*Cin, Lup*Cout]
        bias_f = np.tile(np.asarray(blk["b"], np.float32), lup)[None, :]
        gamma = np.asarray(blk["gamma"], np.float32)[None, :]
        beta = np.asarray(blk["beta"], np.float32)[None, :]
        g = np.tile(np.eye(cout, dtype=np.float32), (lup, 1))  # [Lup*Cout, Cout]
        operands += [
            jnp.asarray(a, jnp.bfloat16),
            jnp.asarray(bias_f), jnp.asarray(gamma), jnp.asarray(beta),
            jnp.asarray(g), jnp.asarray(np.ascontiguousarray(g.T)),
        ]
        l = lup
    lin_w = np.asarray(params["lin_w"], np.float32)          # [Clast, Cf]
    cf = lin_w.shape[1]
    lin_op = np.kron(np.eye(l, dtype=np.float32), lin_w)     # [L*Clast, L*Cf]
    lin_b = np.tile(np.asarray(params["lin_b"], np.float32), l)[None, :]
    operands += [jnp.asarray(lin_op, jnp.bfloat16), jnp.asarray(lin_b)]
    return operands, l, cf


def deconv_decoder_forward(x, params):
    """Equivalent to DeconvDecoder.forward(x, c=None); x: [B, L, latent_dim].

    Default path only: n_conditions=0, pool_method='avg', norm=True,
    BatchNorm in training mode (current-batch statistics).
    """
    batch, l0, c0 = x.shape
    operands, lf, cf = _build_operands(x.shape, params)
    n_blocks = len(params["blocks"])
    x_flat = x.reshape(batch, l0 * c0)
    # NOTE: everything is placed whole in VMEM (no grid) — appropriate for the
    # small shapes this module targets (a few hundred KB total).  For large
    # B*L / channel counts, grid over the Lup*Cout axis with lane-dense
    # BlockSpecs (and a "parallel" axis for v7x's second TensorCore) instead.
    out_flat = pl.pallas_call(
        _make_decoder_kernel(n_blocks),
        out_shape=jax.ShapeDtypeStruct((batch, lf * cf), jnp.float32),
        in_specs=[_vmem_spec()] * (1 + len(operands)),
        out_specs=_vmem_spec(),
    )(x_flat, *operands)
    return out_flat.reshape(batch, lf, cf)


# ----------------------------------------------------------------------------
# Deterministic parameter init (shapes follow DeconvDecoder.__init__)
# ----------------------------------------------------------------------------
def init_params(key, latent_dim, channel_dims, kernel_size, pks):
    dims = [latent_dim] + list(channel_dims)
    blocks = []
    for cin, cout in zip(dims[:-2], dims[1:-1]):
        key, k1, k2, k3, k4 = jax.random.split(key, 5)
        blocks.append(dict(
            w=0.2 * jax.random.normal(k1, (cin, cout, kernel_size), jnp.float32),
            b=0.1 * jax.random.normal(k2, (cout,), jnp.float32),
            gamma=1.0 + 0.1 * jax.random.normal(k3, (cout,), jnp.float32),
            beta=0.1 * jax.random.normal(k4, (cout,), jnp.float32),
            pks=pks,
        ))
    key, k1, k2 = jax.random.split(key, 3)
    lin_w = 0.2 * jax.random.normal(k1, (dims[-2], dims[-1]), jnp.float32)
    lin_b = 0.1 * jax.random.normal(k2, (dims[-1],), jnp.float32)
    return dict(blocks=blocks, lin_w=lin_w, lin_b=lin_b)


# ----------------------------------------------------------------------------
# Pure NumPy reference (mirrors the PyTorch forward, c=None, training mode)
# ----------------------------------------------------------------------------
def _reference_forward(x, params):
    h = np.transpose(np.asarray(x, np.float64), (0, 2, 1))  # NCL, like PyTorch
    for blk in params["blocks"]:
        batch, _, l_in = h.shape
        pks = int(blk["pks"])
        l_out = l_in * pks
        up = np.zeros((batch, h.shape[1], l_out), np.float64)
        for lo in range(l_out):
            pos = lo * (l_in - 1) / (l_out - 1)
            i0 = int(np.floor(pos))
            frac = pos - i0
            i1 = min(i0 + 1, l_in - 1)
            up[:, :, lo] = (1 - frac) * h[:, :, i0] + frac * h[:, :, i1]
        w = np.asarray(blk["w"], np.float64)        # [Cin, Cout, ks]
        bias = np.asarray(blk["b"], np.float64)
        _, cout, ks = w.shape
        p = (ks - 1) // 2
        l_c = l_out + ks - 1 - 2 * p
        y = np.zeros((batch, cout, l_c), np.float64)
        for j in range(l_c):
            for k in range(ks):
                idx = j - k + p
                if 0 <= idx < l_out:
                    y[:, :, j] += up[:, :, idx] @ w[:, :, k]
        y += bias[None, :, None]
        mean = y.mean(axis=(0, 2), keepdims=True)
        var = y.var(axis=(0, 2), keepdims=True)
        y = ((y - mean) / np.sqrt(var + _BN_EPS)
             * np.asarray(blk["gamma"], np.float64)[None, :, None]
             + np.asarray(blk["beta"], np.float64)[None, :, None])
        h = np.maximum(y, 0.0)
    h = np.transpose(h, (0, 2, 1))
    out = h @ np.asarray(params["lin_w"], np.float64) \
        + np.asarray(params["lin_b"], np.float64)
    return np.maximum(out, 0.0)


# ----------------------------------------------------------------------------
if __name__ == "__main__":
    latent_dim = 16
    channel_dims = [12, 8, 10]   # -> blocks 16->12, 12->8, then Linear 8->10
    kernel_size = 3
    pooling_kernel_size = 2
    batch, seq = 2, 8

    key = jax.random.PRNGKey(0)
    key, kx = jax.random.split(key)
    x = jax.random.normal(kx, (batch, seq, latent_dim), jnp.float32)

    params = init_params(key, latent_dim, channel_dims, kernel_size,
                         pooling_kernel_size)

    out = jax.block_until_ready(deconv_decoder_forward(x, params))
    assert out.shape == (batch, seq * pooling_kernel_size ** 2, channel_dims[-1])

    ref = _reference_forward(x, params)
    # bf16 matmul operands (f32 accumulate) -> relaxed tolerance vs f64 ref.
    np.testing.assert_allclose(np.asarray(out), ref, rtol=1e-1, atol=1e-1)
    print("KERNEL_OK")
</pallas_src>

<mosaic_0001>
module attributes {stable_mosaic.version = 11 : i64} {
  func.func @kernel(%arg0: memref<2x128xf32, #tpu.memory_space<vmem>>, %arg1: memref<128x192xbf16, #tpu.memory_space<vmem>>, %arg2: memref<1x192xf32, #tpu.memory_space<vmem>>, %arg3: memref<1x12xf32, #tpu.memory_space<vmem>>, %arg4: memref<1x12xf32, #tpu.memory_space<vmem>>, %arg5: memref<192x12xf32, #tpu.memory_space<vmem>>, %arg6: memref<12x192xf32, #tpu.memory_space<vmem>>, %arg7: memref<192x256xbf16, #tpu.memory_space<vmem>>, %arg8: memref<1x256xf32, #tpu.memory_space<vmem>>, %arg9: memref<1x8xf32, #tpu.memory_space<vmem>>, %arg10: memref<1x8xf32, #tpu.memory_space<vmem>>, %arg11: memref<256x8xf32, #tpu.memory_space<vmem>>, %arg12: memref<8x256xf32, #tpu.memory_space<vmem>>, %arg13: memref<256x320xbf16, #tpu.memory_space<vmem>>, %arg14: memref<1x320xf32, #tpu.memory_space<vmem>>, %arg15: memref<2x320xf32, #tpu.memory_space<vmem>>) attributes {dimension_semantics = [], scalar_prefetch = 0 : i64, scratch_operands = 0 : i64, tpu.core_type = #tpu.core_type<tc>} {
    %c0 = arith.constant 0 : index
    %c0_0 = arith.constant 0 : index
    %0 = vector.load %arg0[%c0, %c0_0] : memref<2x128xf32, #tpu.memory_space<vmem>>, vector<2x128xf32>
    %1 = arith.truncf %0 : vector<2x128xf32> to vector<2x128xbf16>
    %c0_1 = arith.constant 0 : index
    %c0_2 = arith.constant 0 : index
    %2 = vector.load %arg1[%c0_1, %c0_2] : memref<128x192xbf16, #tpu.memory_space<vmem>>, vector<128x192xbf16>
    %cst = arith.constant dense<0.000000e+00> : vector<2x192xf32>
    %3 = tpu.matmul %1, %2, %cst {dimension_numbers = #tpu.dot_dimension_numbers<[1], [0], [0], [1], [0, 0, 1, 1], [], []>} : vector<2x128xbf16>, vector<128x192xbf16>, vector<2x192xf32> -> vector<2x192xf32>
    %c0_3 = arith.constant 0 : index
    %c0_4 = arith.constant 0 : index
    %4 = vector.load %arg2[%c0_3, %c0_4] : memref<1x192xf32, #tpu.memory_space<vmem>>, vector<1x192xf32>
    %5 = vector.broadcast %4 : vector<1x192xf32> to vector<2x192xf32>
    %6 = arith.addf %3, %5 : vector<2x192xf32>
    %c0_5 = arith.constant 0 : index
    %c0_6 = arith.constant 0 : index
    %7 = vector.load %arg5[%c0_5, %c0_6] : memref<192x12xf32, #tpu.memory_space<vmem>>, vector<192x12xf32>
    %cst_7 = arith.constant dense<0.000000e+00> : vector<2x12xf32>
    %8 = tpu.matmul %6, %7, %cst_7 {dimension_numbers = #tpu.dot_dimension_numbers<[1], [0], [0], [1], [0, 0, 1, 1], [], []>} : vector<2x192xf32>, vector<192x12xf32>, vector<2x12xf32> -> vector<2x12xf32>
    %9 = arith.mulf %6, %6 : vector<2x192xf32>
    %c0_8 = arith.constant 0 : index
    %c0_9 = arith.constant 0 : index
    %10 = vector.load %arg5[%c0_8, %c0_9] : memref<192x12xf32, #tpu.memory_space<vmem>>, vector<192x12xf32>
    %cst_10 = arith.constant dense<0.000000e+00> : vector<2x12xf32>
    %11 = tpu.matmul %9, %10, %cst_10 {dimension_numbers = #tpu.dot_dimension_numbers<[1], [0], [0], [1], [0, 0, 1, 1], [], []>} : vector<2x192xf32>, vector<192x12xf32>, vector<2x12xf32> -> vector<2x12xf32>
    %cst_11 = arith.constant dense<0.000000e+00> : vector<12xf32>
    %12 = vector.multi_reduction <add>, %8, %cst_11 [0] : vector<2x12xf32> to vector<12xf32>
    %13 = vector.shape_cast %12 : vector<12xf32> to vector<1x12xf32>
    %cst_12 = arith.constant 3.125000e-02 : f32
    %14 = vector.broadcast %cst_12 : f32 to vector<1x12xf32>
    %15 = arith.mulf %13, %14 : vector<1x12xf32>
    %cst_13 = arith.constant dense<0.000000e+00> : vector<12xf32>
    %16 = vector.multi_reduction <add>, %11, %cst_13 [0] : vector<2x12xf32> to vector<12xf32>
    %17 = vector.shape_cast %16 : vector<12xf32> to vector<1x12xf32>
    %cst_14 = arith.constant 3.125000e-02 : f32
    %18 = vector.broadcast %cst_14 : f32 to vector<1x12xf32>
    %19 = arith.mulf %17, %18 : vector<1x12xf32>
    %20 = arith.mulf %15, %15 : vector<1x12xf32>
    %21 = arith.subf %19, %20 : vector<1x12xf32>
    %c0_15 = arith.constant 0 : index
    %c0_16 = arith.constant 0 : index
    %22 = vector.load %arg3[%c0_15, %c0_16] : memref<1x12xf32, #tpu.memory_space<vmem>>, vector<1x12xf32>
    %cst_17 = arith.constant 9.99999974E-6 : f32
    %23 = vector.broadcast %cst_17 : f32 to vector<1x12xf32>
    %24 = arith.addf %21, %23 : vector<1x12xf32>
    %25 = math.rsqrt %24 : vector<1x12xf32>
    %26 = arith.mulf %22, %25 : vector<1x12xf32>
    %c0_18 = arith.constant 0 : index
    %c0_19 = arith.constant 0 : index
    %27 = vector.load %arg4[%c0_18, %c0_19] : memref<1x12xf32, #tpu.memory_space<vmem>>, vector<1x12xf32>
    %28 = arith.mulf %15, %26 : vector<1x12xf32>
    %29 = arith.subf %27, %28 : vector<1x12xf32>
    %c0_20 = arith.constant 0 : index
    %c0_21 = arith.constant 0 : index
    %30 = vector.load %arg6[%c0_20, %c0_21] : memref<12x192xf32, #tpu.memory_space<vmem>>, vector<12x192xf32>
    %cst_22 = arith.constant dense<0.000000e+00> : vector<1x192xf32>
    %31 = tpu.matmul %26, %30, %cst_22 {dimension_numbers = #tpu.dot_dimension_numbers<[1], [0], [0], [1], [0, 0, 1, 1], [], []>} : vector<1x12xf32>, vector<12x192xf32>, vector<1x192xf32> -> vector<1x192xf32>
    %c0_23 = arith.constant 0 : index
    %c0_24 = arith.constant 0 : index
    %32 = vector.load %arg6[%c0_23, %c0_24] : memref<12x192xf32, #tpu.memory_space<vmem>>, vector<12x192xf32>
    %cst_25 = arith.constant dense<0.000000e+00> : vector<1x192xf32>
    %33 = tpu.matmul %29, %32, %cst_25 {dimension_numbers = #tpu.dot_dimension_numbers<[1], [0], [0], [1], [0, 0, 1, 1], [], []>} : vector<1x12xf32>, vector<12x192xf32>, vector<1x192xf32> -> vector<1x192xf32>
    %34 = vector.broadcast %31 : vector<1x192xf32> to vector<2x192xf32>
    %35 = arith.mulf %6, %34 : vector<2x192xf32>
    %36 = vector.broadcast %33 : vector<1x192xf32> to vector<2x192xf32>
    %37 = arith.addf %35, %36 : vector<2x192xf32>
    %cst_26 = arith.constant 0.000000e+00 : f32
    %38 = vector.broadcast %cst_26 : f32 to vector<2x192xf32>
    %39 = arith.maximumf %37, %38 : vector<2x192xf32>
    %40 = arith.truncf %39 : vector<2x192xf32> to vector<2x192xbf16>
    %c0_27 = arith.constant 0 : index
    %c0_28 = arith.constant 0 : index
    %41 = vector.load %arg7[%c0_27, %c0_28] : memref<192x256xbf16, #tpu.memory_space<vmem>>, vector<192x256xbf16>
    %cst_29 = arith.constant dense<0.000000e+00> : vector<2x256xf32>
    %42 = tpu.matmul %40, %41, %cst_29 {dimension_numbers = #tpu.dot_dimension_numbers<[1], [0], [0], [1], [0, 0, 1, 1], [], []>} : vector<2x192xbf16>, vector<192x256xbf16>, vector<2x256xf32> -> vector<2x256xf32>
    %c0_30 = arith.constant 0 : index
    %c0_31 = arith.constant 0 : index
    %43 = vector.load %arg8[%c0_30, %c0_31] : memref<1x256xf32, #tpu.memory_space<vmem>>, vector<1x256xf32>
    %44 = vector.broadcast %43 : vector<1x256xf32> to vector<2x256xf32>
    %45 = arith.addf %42, %44 : vector<2x256xf32>
    %c0_32 = arith.constant 0 : index
    %c0_33 = arith.constant 0 : index
    %46 = vector.load %arg11[%c0_32, %c0_33] : memref<256x8xf32, #tpu.memory_space<vmem>>, vector<256x8xf32>
    %cst_34 = arith.constant dense<0.000000e+00> : vector<2x8xf32>
    %47 = tpu.matmul %45, %46, %cst_34 {dimension_numbers = #tpu.dot_dimension_numbers<[1], [0], [0], [1], [0, 0, 1, 1], [], []>} : vector<2x256xf32>, vector<256x8xf32>, vector<2x8xf32> -> vector<2x8xf32>
    %48 = arith.mulf %45, %45 : vector<2x256xf32>
    %c0_35 = arith.constant 0 : index
    %c0_36 = arith.constant 0 : index
    %49 = vector.load %arg11[%c0_35, %c0_36] : memref<256x8xf32, #tpu.memory_space<vmem>>, vector<256x8xf32>
    %cst_37 = arith.constant dense<0.000000e+00> : vector<2x8xf32>
    %50 = tpu.matmul %48, %49, %cst_37 {dimension_numbers = #tpu.dot_dimension_numbers<[1], [0], [0], [1], [0, 0, 1, 1], [], []>} : vector<2x256xf32>, vector<256x8xf32>, vector<2x8xf32> -> vector<2x8xf32>
    %cst_38 = arith.constant dense<0.000000e+00> : vector<8xf32>
    %51 = vector.multi_reduction <add>, %47, %cst_38 [0] : vector<2x8xf32> to vector<8xf32>
    %52 = vector.shape_cast %51 : vector<8xf32> to vector<1x8xf32>
    %cst_39 = arith.constant 1.562500e-02 : f32
    %53 = vector.broadcast %cst_39 : f32 to vector<1x8xf32>
    %54 = arith.mulf %52, %53 : vector<1x8xf32>
    %cst_40 = arith.constant dense<0.000000e+00> : vector<8xf32>
    %55 = vector.multi_reduction <add>, %50, %cst_40 [0] : vector<2x8xf32> to vector<8xf32>
    %56 = vector.shape_cast %55 : vector<8xf32> to vector<1x8xf32>
    %cst_41 = arith.constant 1.562500e-02 : f32
    %57 = vector.broadcast %cst_41 : f32 to vector<1x8xf32>
    %58 = arith.mulf %56, %57 : vector<1x8xf32>
    %59 = arith.mulf %54, %54 : vector<1x8xf32>
    %60 = arith.subf %58, %59 : vector<1x8xf32>
    %c0_42 = arith.constant 0 : index
    %c0_43 = arith.constant 0 : index
    %61 = vector.load %arg9[%c0_42, %c0_43] : memref<1x8xf32, #tpu.memory_space<vmem>>, vector<1x8xf32>
    %cst_44 = arith.constant 9.99999974E-6 : f32
    %62 = vector.broadcast %cst_44 : f32 to vector<1x8xf32>
    %63 = arith.addf %60, %62 : vector<1x8xf32>
    %64 = math.rsqrt %63 : vector<1x8xf32>
    %65 = arith.mulf %61, %64 : vector<1x8xf32>
    %c0_45 = arith.constant 0 : index
    %c0_46 = arith.constant 0 : index
    %66 = vector.load %arg10[%c0_45, %c0_46] : memref<1x8xf32, #tpu.memory_space<vmem>>, vector<1x8xf32>
    %67 = arith.mulf %54, %65 : vector<1x8xf32>
    %68 = arith.subf %66, %67 : vector<1x8xf32>
    %c0_47 = arith.constant 0 : index
    %c0_48 = arith.constant 0 : index
    %69 = vector.load %arg12[%c0_47, %c0_48] : memref<8x256xf32, #tpu.memory_space<vmem>>, vector<8x256xf32>
    %cst_49 = arith.constant dense<0.000000e+00> : vector<1x256xf32>
    %70 = tpu.matmul %65, %69, %cst_49 {dimension_numbers = #tpu.dot_dimension_numbers<[1], [0], [0], [1], [0, 0, 1, 1], [], []>} : vector<1x8xf32>, vector<8x256xf32>, vector<1x256xf32> -> vector<1x256xf32>
    %c0_50 = arith.constant 0 : index
    %c0_51 = arith.constant 0 : index
    %71 = vector.load %arg12[%c0_50, %c0_51] : memref<8x256xf32, #tpu.memory_space<vmem>>, vector<8x256xf32>
    %cst_52 = arith.constant dense<0.000000e+00> : vector<1x256xf32>
    %72 = tpu.matmul %68, %71, %cst_52 {dimension_numbers = #tpu.dot_dimension_numbers<[1], [0], [0], [1], [0, 0, 1, 1], [], []>} : vector<1x8xf32>, vector<8x256xf32>, vector<1x256xf32> -> vector<1x256xf32>
    %73 = vector.broadcast %70 : vector<1x256xf32> to vector<2x256xf32>
    %74 = arith.mulf %45, %73 : vector<2x256xf32>
    %75 = vector.broadcast %72 : vector<1x256xf32> to vector<2x256xf32>
    %76 = arith.addf %74, %75 : vector<2x256xf32>
    %cst_53 = arith.constant 0.000000e+00 : f32
    %77 = vector.broadcast %cst_53 : f32 to vector<2x256xf32>
    %78 = arith.maximumf %76, %77 : vector<2x256xf32>
    %79 = arith.truncf %78 : vector<2x256xf32> to vector<2x256xbf16>
    %c0_54 = arith.constant 0 : index
    %c0_55 = arith.constant 0 : index
    %80 = vector.load %arg13[%c0_54, %c0_55] : memref<256x320xbf16, #tpu.memory_space<vmem>>, vector<256x320xbf16>
    %cst_56 = arith.constant dense<0.000000e+00> : vector<2x320xf32>
    %81 = tpu.matmul %79, %80, %cst_56 {dimension_numbers = #tpu.dot_dimension_numbers<[1], [0], [0], [1], [0, 0, 1, 1], [], []>} : vector<2x256xbf16>, vector<256x320xbf16>, vector<2x320xf32> -> vector<2x320xf32>
    %c0_57 = arith.constant 0 : index
    %c0_58 = arith.constant 0 : index
    %82 = vector.load %arg14[%c0_57, %c0_58] : memref<1x320xf32, #tpu.memory_space<vmem>>, vector<1x320xf32>
    %83 = vector.broadcast %82 : vector<1x320xf32> to vector<2x320xf32>
    %84 = arith.addf %81, %83 : vector<2x320xf32>
    %cst_59 = arith.constant 0.000000e+00 : f32
    %85 = vector.broadcast %cst_59 : f32 to vector<2x320xf32>
    %86 = arith.maximumf %84, %85 : vector<2x320xf32>
    %c0_60 = arith.constant 0 : index
    %c0_61 = arith.constant 0 : index
    %87 = vector.load %arg15[%c0_60, %c0_61] : memref<2x320xf32, #tpu.memory_space<vmem>>, vector<2x320xf32>
    tpu.vector_store %arg15[%c0_60, %c0_61], %86 {strides = array<i32>} : memref<2x320xf32, #tpu.memory_space<vmem>>, vector<2x320xf32>,
    return
  }
}

</mosaic_0001>

<bundles_post_ra>
// kernel: tpu_custom_call.1
= control target key start
LH: loop header
LB: loop body
LE: loop exit
PB: predicated region body
PF: predicated region fallthrough
CT: control target
= control target key end

     0   :  { %v2119_v2 = vmov 0   ;;  %v2120_v3 = vmov 0.0|0.0   ;;  %s2794_s0 = inlined_call_operand.vmem [shape: f32[2,128], index: 0, kind: input, shape index: {}]   ;;  %s2795_s1 = inlined_call_operand.vmem [shape: bf16[128,192], index: 1, kind: input, shape index: {}]   ;;  %s2796_s2 = inlined_call_operand.vmem [shape: f32[1,192], index: 2, kind: input, shape index: {}]   ;;  %s2797_s3 = inlined_call_operand.vmem [shape: f32[1,12], index: 3, kind: input, shape index: {}]   ;;  %s2798_s4 = inlined_call_operand.vmem [shape: f32[1,12], index: 4, kind: input, shape index: {}]   ;;  %s2799_s5 = inlined_call_operand.vmem [shape: f32[192,12], index: 5, kind: input, shape index: {}]   ;;  %s2800_s6 = inlined_call_operand.vmem [shape: f32[12,192], index: 6, kind: input, shape index: {}]   ;;  %s2801_s7 = inlined_call_operand.vmem [shape: bf16[192,256], index: 7, kind: input, shape index: {}]   ;;  %s2802_s8 = inlined_call_operand.vmem [shape: f32[1,256], index: 8, kind: input, shape index: {}]   ;;  %s2803_s9 = inlined_call_operand.vmem [shape: f32[1,8], index: 9, kind: input, shape index: {}]   ;;  %s2804_s10 = inlined_call_operand.vmem [shape: f32[1,8], index: 10, kind: input, shape index: {}]   ;;  %s2805_s11 = inlined_call_operand.vmem [shape: f32[256,8], index: 11, kind: input, shape index: {}]   ;;  %s2806_s12 = inlined_call_operand.vmem [shape: f32[8,256], index: 12, kind: input, shape index: {}]   ;;  %s2807_s13 = inlined_call_operand.vmem [shape: bf16[256,320], index: 13, kind: input, shape index: {}]   ;;  %s2808_s14 = inlined_call_operand.vmem [shape: f32[1,320], index: 14, kind: input, shape index: {}]   ;;  %s2809_s15 = inlined_call_operand.hbm [shape: f32[2,320], index: 15, kind: output, shape index: {}]  }
   0x1   :  { %v1967_v0 = vld [vmem:[%s2795_s1 + $0x4] ss:$8 sps:$4 sm:$0xff]   ;;  %v1969_v1 = vld [vmem:[%s2795_s1] ss:$8 sps:$4 sm:$0xff]   ;;  %194 = vmatprep.mubr.bf16.mxu0 %v2119_v2  ;;  %1813 = vmatprep.subr.bf16.mxu1 %v2120_v3  ;;  %v1970_v4 = vld [vmem:[%s2795_s1 + $0x14] ss:$8 sps:$4 sm:$0xff]  }
   0x2   :  { %162 = vmatprep.subr.bf16.mxu0 %v1967_v0  ;;  %v1972_v5 = vld [vmem:[%s2795_s1 + $0x10] ss:$8 sps:$4 sm:$0xff]   ;;  %v1973_v6 = vld [vmem:[%s2795_s1 + $0x24] ss:$8 sps:$4 sm:$0xff]   ;;  %v1975_v7 = vld [vmem:[%s2795_s1 + $0x20] ss:$8 sps:$4 sm:$0xff]  }
   0x3   :  { %163 = vmatpush1.bf16.msra.mxu0 %v1969_v1  ;;  %v1976_v8 = vld [vmem:[%s2795_s1 + $0x34] ss:$8 sps:$4 sm:$0xff]   ;;  %v1978_v9 = vld [vmem:[%s2795_s1 + $0x30] ss:$8 sps:$4 sm:$0xff]   ;;  %v203_v10 = vld [vmem:[%s2799_s5] sm:$0xff] }
   0x4   :  { %164 = vmatprep.subr.bf16.mxu0 %v1970_v4  ;;  %v204_v11 = vld [vmem:[%s2799_s5 + $0x8] sm:$0xff]  ;;  %v205_v12 = vld [vmem:[%s2799_s5 + $0x10] sm:$0xff]  ;;  %v206_v15 = vld [vmem:[%s2799_s5 + $0x18] sm:$0xff] }
   0x5   :  { %v1979_v13 = vld [vmem:[%s2795_s1 + $0x44] ss:$8 sps:$4 sm:$0xff]   ;;  %v1814_v14 = vpack.c.bf16 %v204_v11, %v203_v10  ;;  %v1817_v16 = vpack.c.bf16 %v206_v15, %v205_v12  ;;  %v1981_v17 = vld [vmem:[%s2795_s1 + $0x40] ss:$8 sps:$4 sm:$0xff]   ;;  %v1982_v20 = vld [vmem:[%s2795_s1 + $0x54] ss:$8 sps:$4 sm:$0xff]  }
   0x6   :  { %v207_v18 = vld [vmem:[%s2799_s5 + $0x20] sm:$0xff]  ;;  %v208_v19 = vld [vmem:[%s2799_s5 + $0x28] sm:$0xff]  ;;  %v1984_v21 = vld [vmem:[%s2795_s1 + $0x50] ss:$8 sps:$4 sm:$0xff]  }
   0x7   :  { %165 = vmatpush1.bf16.msra.mxu0 %v1972_v5  ;;  %1815 = vmatpush1.bf16.msra.mxu1 %v1814_v14  ;;  %v1985_v22 = vld [vmem:[%s2795_s1 + $0x64] ss:$8 sps:$4 sm:$0xff]   ;;  %v1820_v23 = vpack.c.bf16 %v208_v19, %v207_v18  ;;  %v209_v24 = vld [vmem:[%s2799_s5 + $0x30] sm:$0xff]  ;;  %v210_v25 = vld [vmem:[%s2799_s5 + $0x38] sm:$0xff] }
   0x8   :  { %166 = vmatprep.subr.bf16.mxu0 %v1973_v6  ;;  %1816 = vmatprep.subr.bf16.mxu1 %v2120_v3  ;;  %v1987_v26 = vld [vmem:[%s2795_s1 + $0x60] ss:$8 sps:$4 sm:$0xff]   ;;  %v1988_v29 = vld [vmem:[%s2795_s1 + $0x74] ss:$8 sps:$4 sm:$0xff]   ;;  %v1823_v30 = vpack.c.bf16 %v210_v25, %v209_v24  ;;  %v1990_v31 = vld [vmem:[%s2795_s1 + $0x70] ss:$8 sps:$4 sm:$0xff]  }
   0x9   :  { %v211_v27 = vld [vmem:[%s2799_s5 + $0x40] sm:$0xff]  ;;  %v212_v28 = vld [vmem:[%s2799_s5 + $0x48] sm:$0xff]  ;;  %v213_v33 = vld [vmem:[%s2799_s5 + $0x50] sm:$0xff] }
   0xa   :  { %v52_v32 = vld [vmem:[%s2794_s0] sm:$0x3]  ;;  %v214_v34 = vld [vmem:[%s2799_s5 + $0x58] sm:$0xff]  ;;  %v1826_v35 = vpack.c.bf16 %v212_v28, %v211_v27  ;;  %v216_v37 = vld [vmem:[%s2799_s5 + $0x68] sm:$0xff] }
   0xb   :  { %167 = vmatpush1.bf16.msra.mxu0 %v1975_v7  ;;  %1818 = vmatpush1.bf16.msra.mxu1 %v1817_v16  ;;  %v215_v36 = vld [vmem:[%s2799_s5 + $0x60] sm:$0xff]  ;;  %v53_v38 = vpack.c.bf16 %v52_v32, %v52_v32  ;;  %v1829_v39 = vpack.c.bf16 %v214_v34, %v213_v33  ;;  %v217_v40 = vld [vmem:[%s2799_s5 + $0x70] sm:$0xff]  ;;  %v218_v41 = vld [vmem:[%s2799_s5 + $0x78] sm:$0xff] }
   0xc   :  { %168 = vmatprep.subr.bf16.mxu0 %v1976_v8  ;;  %1819 = vmatprep.subr.bf16.mxu1 %v2120_v3  ;;  %v1832_v42 = vpack.c.bf16 %v216_v37, %v215_v36  ;;  %v219_v43 = vld [vmem:[%s2799_s5 + $0x80] sm:$0xff]  ;;  %v220_v44 = vld [vmem:[%s2799_s5 + $0x88] sm:$0xff]  ;;  %v1835_v45 = vpack.c.bf16 %v218_v41, %v217_v40  ;;  %v221_v46 = vld [vmem:[%s2799_s5 + $0x90] sm:$0xff] }
   0xd   :  { %v222_v47 = vld [vmem:[%s2799_s5 + $0x98] sm:$0xff]  ;;  %v1838_v48 = vpack.c.bf16 %v220_v44, %v219_v43  ;;  %v223_v49 = vld [vmem:[%s2799_s5 + $0xa0] sm:$0xff]  ;;  %v224_v50 = vld [vmem:[%s2799_s5 + $0xa8] sm:$0xff] }
   0xe   :  { %v1841_v51 = vpack.c.bf16 %v222_v47, %v221_v46 }
   0xf   :  { %169 = vmatpush1.bf16.msra.mxu0 %v1978_v9  ;;  %1821 = vmatpush1.bf16.msra.mxu1 %v1820_v23 }
  0x10   :  { %170 = vmatprep.subr.bf16.mxu0 %v1979_v13  ;;  %1822 = vmatprep.subr.bf16.mxu1 %v2120_v3 }
  0x13   :  { %171 = vmatpush1.bf16.msra.mxu0 %v1981_v17  ;;  %1824 = vmatpush1.bf16.msra.mxu1 %v1823_v30 }
  0x14   :  { %172 = vmatprep.subr.bf16.mxu0 %v1982_v20  ;;  %1825 = vmatprep.subr.bf16.mxu1 %v2120_v3 }
  0x17   :  { %173 = vmatpush1.bf16.msra.mxu0 %v1984_v21  ;;  %1827 = vmatpush1.bf16.msra.mxu1 %v1826_v35 }
  0x18   :  { %174 = vmatprep.subr.bf16.mxu0 %v1985_v22  ;;  %1828 = vmatprep.subr.bf16.mxu1 %v2120_v3 }
  0x1b   :  { %175 = vmatpush1.bf16.msra.mxu0 %v1987_v26  ;;  %1830 = vmatpush1.bf16.msra.mxu1 %v1829_v39 }
  0x1c   :  { %176 = vmatprep.subr.bf16.mxu0 %v1988_v29  ;;  %1831 = vmatprep.subr.bf16.mxu1 %v2120_v3 }
  0x1f   :  { %177 = vmatpush1.bf16.msra.mxu0 %v1990_v31  ;;  %1833 = vmatpush1.bf16.msra.mxu1 %v1832_v42 }
  0x20   :  { %1849 = vmatprep.subr.bf16.mxu0 %v2120_v3  ;;  %1834 = vmatprep.subr.bf16.mxu1 %v2120_v3 }
  0x22   :  { %195 = vmatmul.mubr.bf16.vlgmr.msra.gmra.mrb[0].mxu0 %v53_v38 }
  0x23   :  { %1851 = vmatpush1.bf16.msra.mxu0 %v1814_v14  ;;  %1836 = vmatpush1.bf16.msra.mxu1 %v1835_v45 }
  0x24   :  { %1852 = vmatprep.subr.bf16.mxu0 %v2120_v3  ;;  %1837 = vmatprep.subr.bf16.mxu1 %v2120_v3 }
  0x27   :  { %1854 = vmatpush1.bf16.msra.mxu0 %v1817_v16  ;;  %1839 = vmatpush1.bf16.msra.mxu1 %v1838_v48 }
  0x28   :  { %1855 = vmatprep.subr.bf16.mxu0 %v2120_v3  ;;  %1840 = vmatprep.subr.bf16.mxu1 %v2120_v3 }
  0x2b   :  { %1857 = vmatpush1.bf16.msra.mxu0 %v1820_v23 }
  0x2c   :  { %1858 = vmatprep.subr.bf16.mxu0 %v2120_v3 }
  0x2f   :  { %1860 = vmatpush1.bf16.msra.mxu0 %v1823_v30 }
  0x30   :  { %1861 = vmatprep.subr.bf16.mxu0 %v2120_v3 }
  0x31   :  { %20 = vsyncpa [#allocation3], 0  ;;  %1842 = vmatpush1.bf16.msra.mxu1 %v1841_v51  ;;  %v1844_v52 = vpack.c.bf16 %v224_v50, %v223_v49  ;;  %v225_v53 = vld [vmem:[%s2799_s5 + $0xb0] sm:$0xff]  ;;  %v226_v54 = vld [vmem:[%s2799_s5 + $0xb8] sm:$0xff]  ;;  %v72_v56 = vlaneseq  ;;  %vm227_vm0 = vcmask 523264   ;;  %vm410_vm1 = vcmask 1043456  }
  0x32   :  { %1843 = vmatprep.subr.bf16.mxu1 %v2120_v3  ;;  %v1847_v55 = vpack.c.bf16 %v226_v54, %v225_v53  ;;  %v70_v59 = vld [vmem:[%s2796_s2] sm:$0x3]  ;;  %v403_v7 = vld [vmem:[%s2800_s6 + $0x8] sm:$0xff]  ;;  %v405_v8 = vld [vmem:[%s2800_s6 + $0x18] sm:$0xf]  ;;  %vm2121_vm2 = vmmov 1  }
  0x33   :  { %1863 = vmatpush1.bf16.msra.mxu0 %v1826_v35  ;;  %v2352_v57 = vshrl.u32 %v72_v56, 7  ;;  %v402_v9 = vld [vmem:[%s2800_s6] sm:$0xff]  ;;  %v1885_v10 = vpack.c.bf16 %v405_v8, %v403_v7  ;;  %vm2386_vm3 = vmpackc.low %vm410_vm1, %vm2121_vm2  ;;  %v404_v12 = vld [vmem:[%s2800_s6 + $0x10] sm:$0xf]  ;;  %v2122_v14 = vmov 0.0   ;;  %vm376_vm4 = vcmask 91136  }
  0x34   :  { %1864 = vmatprep.subr.bf16.mxu0 %v2120_v3  ;;  %v1888_v13 = vpack.c.bf16 %v404_v12, %v402_v9  ;;  %v395_v38 = vld [vmem:[%s2797_s3] sm:$0x1]  ;;  %vm406_vm5 = vcmask 97280   ;;  %v1993_v41 = vld [vmem:[%s2801_s7 + $0x4] ss:$8 sps:$4 sm:$0xff]   ;;  %vm960_vm6 = vcmask 58368  }
  0x35   :  { %1845 = vmatpush1.bf16.msra.mxu1 %v1844_v52  ;;  %v2355_v58 = vsub.s32 0, %v2352_v57  ;;  %v2361_v60 = vsub.s32 1, %v2352_v57  ;;  %v1991_v44 = vld [vmem:[%s2801_s7] ss:$8 sps:$4 sm:$0xff]   ;;  %v1996_v46 = vld [vmem:[%s2801_s7 + $0x14] ss:$8 sps:$4 sm:$0xff]  }
  0x36   :  { %1846 = vmatprep.subr.bf16.mxu1 %v2120_v3  ;;  %v1994_v47 = vld [vmem:[%s2801_s7 + $0x10] ss:$8 sps:$4 sm:$0xff]   ;;  %v1997_v49 = vld [vmem:[%s2801_s7 + $0x20] ss:$8 sps:$4 sm:$0xff]   ;;  %v2002_v50 = vld [vmem:[%s2801_s7 + $0x34] ss:$8 sps:$4 sm:$0xff]  }
  0x37   :  { %1866 = vmatpush1.bf16.msra.mxu0 %v1829_v39  ;;  %v75_v61 = vrot.slane %v70_v59, %v2355_v58  ;;  %v79_v62 = vrot.slane %v70_v59, %v2361_v60  ;;  %v2003_v53 = vld [vmem:[%s2801_s7 + $0x40] ss:$8 sps:$4 sm:$0xff]   ;;  %v2008_v54 = vld [vmem:[%s2801_s7 + $0x54] ss:$8 sps:$4 sm:$0xff]   ;;  %v2011_v56 = vld [vmem:[%s2801_s7 + $0x64] ss:$8 sps:$4 sm:$0xff]  }
  0x38   :  { %1867 = vmatprep.subr.bf16.mxu0 %v2120_v3  ;;  %v2009_v59 = vld [vmem:[%s2801_s7 + $0x60] ss:$8 sps:$4 sm:$0xff]   ;;  %v2026_v7 = vld [vmem:[%s2801_s7 + $0xb4] ss:$8 sps:$4 sm:$0xff]   ;;  %v2024_v8 = vld [vmem:[%s2801_s7 + $0xb0] ss:$8 sps:$4 sm:$0xff]  }
  0x39   :  { %1848 = vmatpush1.bf16.msra.mxu1 %v1847_v55  ;;  %v802_v9 = vld [vmem:[%s2805_s11 + $0x80] sm:$0xff]  ;;  %vm988_vm7 = vcmask 64512   ;;  %vm1602_vm8 = vcmask 1041408   ;;  %vm1603_vm9 = vcmask 1043458   ;;  %vm1605_vm11 = vcmask 521220  }
  0x3a   :  { %1887 = vmatprep.subr.msk.bf16.mxu1 %vm2386_vm3, %v1885_v10  ;;  %v786_v11 = vld [vmem:[%s2805_s11] sm:$0xff]  ;;  %vm1604_vm10 = vmor %vm1603_vm9, %vm1602_vm8 }
  0x3b   :  { %1869 = vmatpush1.bf16.msra.mxu0 %v1832_v42  ;;  %v399_v42 = vld [vmem:[%s2798_s4] sm:$0x1]  ;;  %vm1606_vm12 = vmor %vm1605_vm11, %vm1604_vm10 }
  0x3c   :  { %1870 = vmatprep.subr.bf16.mxu0 %v2120_v3 }
  0x3f   :  { %1872 = vmatpush1.bf16.msra.mxu0 %v1835_v45 }
  0x40   :  { %1873 = vmatprep.subr.bf16.mxu0 %v2120_v3 }
  0x43   :  { %1875 = vmatpush1.bf16.msra.mxu0 %v1838_v48  ;;  %v1999_v48 = vld [vmem:[%s2801_s7 + $0x24] ss:$8 sps:$4 sm:$0xff]  }
  0x44   :  { %1876 = vmatprep.subr.bf16.mxu0 %v2120_v3 }
  0x47   :  { %1878 = vmatpush1.bf16.msra.mxu0 %v1841_v51  ;;  %v2000_v51 = vld [vmem:[%s2801_s7 + $0x30] ss:$8 sps:$4 sm:$0xff]  }
  0x48   :  { %1879 = vmatprep.subr.bf16.mxu0 %v2120_v3 }
  0x4b   :  { %1881 = vmatpush1.bf16.msra.mxu0 %v1844_v52  ;;  %v2005_v52 = vld [vmem:[%s2801_s7 + $0x44] ss:$8 sps:$4 sm:$0xff]  }
  0x4c   :  { %1882 = vmatprep.subr.bf16.mxu0 %v2120_v3 }
  0x4f   :  { %1884 = vmatpush1.bf16.msra.mxu0 %v1847_v55  ;;  %v2006_v55 = vld [vmem:[%s2801_s7 + $0x50] ss:$8 sps:$4 sm:$0xff]  }
  0xf5   :  { %v196_v63 = vpop.f32.mrb[0].mxu0 }
  0xf6   :  { %v2365_v0 = vadd.f32 %v196_v63, %v75_v61  ;;  %v198_v1 = vpop.f32.mrb[1].mxu0  ;;  %v2014_v61 = vld [vmem:[%s2801_s7 + $0x74] ss:$8 sps:$4 sm:$0xff]   ;;  %v2017_v63 = vld [vmem:[%s2801_s7 + $0x84] ss:$8 sps:$4 sm:$0xff]  }
  0xf7   :  { %v2367_v2 = vadd.f32 %v198_v1, %v79_v62  ;;  %v200_v3 = vpop.f32.mrb[2].mxu0  ;;  %v2012_v62 = vld [vmem:[%s2801_s7 + $0x70] ss:$8 sps:$4 sm:$0xff]   ;;  %v2015_v1 = vld [vmem:[%s2801_s7 + $0x80] ss:$8 sps:$4 sm:$0xff]  }
  0xf8   :  { %v201_v4 = vpop.f32.mrb[3].mxu0  ;;  %v301_v6 = vmul.f32 %v2365_v0, %v2365_v0  ;;  %v2020_v3 = vld [vmem:[%s2801_s7 + $0x94] ss:$8 sps:$4 sm:$0xff]  }
  0xf9   :  { %v302_v5 = vmul.f32 %v2367_v2, %v2367_v2  ;;  %1638 = vmatprep.mubr.msk.f32.mxu1 %vm227_vm0, %v2367_v2  ;;  %v2018_v4 = vld [vmem:[%s2801_s7 + $0x90] ss:$8 sps:$4 sm:$0xff]  }
  0xfa   :  { %296 = vmatmul.mubr.f32.vlgmr.msra.gmra.mrb[0].mxu1 %v2365_v0 }
  0xfb   :  { %1639 = vmatprep.mubr.msk.f32.mxu0 %vm227_vm0, %v302_v5  ;;  %481 = vmatprep.mubr.f32.mxu1 %v2122_v14  ;;  %v2023_v5 = vld [vmem:[%s2801_s7 + $0xa4] ss:$8 sps:$4 sm:$0xff]  }
  0xfc   :  { %371 = vmatmul.mubr.f32.vlgmr.msra.gmra.mrb[4].mxu0 %v301_v6  ;;  %1890 = vmatpush1.bf16.msk.msra.mxu1 %vm2386_vm3, %v1888_v13  ;;  %v2021_v6 = vld [vmem:[%s2801_s7 + $0xa0] ss:$8 sps:$4 sm:$0xff]  }
  0xfd   :  { %1893 = vmatprep.subr.msk.bf16.mxu1 %vm2386_vm3, %v1885_v10  ;;  %v803_v10 = vld [vmem:[%s2805_s11 + $0x88] sm:$0xff] }
  0xfe   :  { %v1897_v12 = vpack.c.bf16 %v803_v10, %v802_v9  ;;  %v800_v10 = vld [vmem:[%s2805_s11 + $0x70] sm:$0xff] }
 0x100   :  { %1898 = vmatprep.subr.bf16.mxu0 %v1897_v12 }
 0x1cd   :  { %v297_v15 = vpop.f32.mrb[0].mxu1 }
 0x1ce   :  { %v377_v16 = vsel %vm376_vm4, %v297_v15, 0.0  ;;  %v299_v17 = vpop.f32.mrb[1].mxu1  ;;  %v804_v15 = vld [vmem:[%s2805_s11 + $0x90] sm:$0xff] }
 0x1cf   :  { %v378_v18 = vrot.slane %v377_v16, 4  ;;  %v372_v19 = vpop.f32.mrb[4].mxu0 }
 0x1d0   :  { %v385_v20 = vsel %vm376_vm4, %v372_v19, 0.0  ;;  %v374_v21 = vpop.f32.mrb[5].mxu0  ;;  %v788_v19 = vld [vmem:[%s2805_s11 + $0x10] sm:$0xff] }
 0x1d1   :  { %v379_v22 = vadd.f32 %v378_v18, %v377_v16  ;;  %v386_v23 = vrot.slane %v385_v20, 4  ;;  %v805_v16 = vld [vmem:[%s2805_s11 + $0x98] sm:$0xff] }
 0x1d2   :  { %v2501_v18 = vpack.c.bf16 %v805_v16, %v804_v15 }
 0x1d3   :  { %v380_v24 = vrot.slane %v379_v22, 2  ;;  %v387_v25 = vadd.f32 %v386_v23, %v385_v20  ;;  %v789_v20 = vld [vmem:[%s2805_s11 + $0x18] sm:$0xff]  ;;  %v807_v23 = vld [vmem:[%s2805_s11 + $0xa8] sm:$0xff] }
 0x1d4   :  { %v1903_v21 = vpack.c.bf16 %v789_v20, %v788_v19 }
 0x1d5   :  { %v381_v26 = vadd.f32 %v380_v24, %v379_v22  ;;  %v388_v27 = vrot.slane %v387_v25, 2  ;;  %v806_v22 = vld [vmem:[%s2805_s11 + $0xa0] sm:$0xff] }
 0x1d6   :  { %v790_v24 = vld [vmem:[%s2805_s11 + $0x20] sm:$0xff] }
 0x1d7   :  { %v382_v28 = vrot.slane %v381_v26, 1  ;;  %v389_v29 = vadd.f32 %v388_v27, %v387_v25  ;;  %v1905_v25 = vpack.c.bf16 %v807_v23, %v806_v22 }
 0x1d9   :  { %v383_v30 = vadd.f32 %v382_v28, %v381_v26  ;;  %v390_v31 = vrot.slane %v389_v29, 1  ;;  %v791_v26 = vld [vmem:[%s2805_s11 + $0x28] sm:$0xff]  ;;  %v808_v28 = vld [vmem:[%s2805_s11 + $0xb0] sm:$0xff] }
 0x1da   :  { %v1907_v27 = vpack.c.bf16 %v791_v26, %v790_v24  ;;  %v2614_v26 = vld [vmem:[%s2806_s12] sm:$0xff] }
 0x1db   :  { %v384_v32 = vmul.f32 0.03125, %v383_v30  ;;  %v391_v33 = vadd.f32 %v390_v31, %v389_v29  ;;  %v809_v29 = vld [vmem:[%s2805_s11 + $0xb8] sm:$0xff]  ;;  %v792_v30 = vld [vmem:[%s2805_s11 + $0x30] sm:$0xff] }
 0x1dc   :  { %v1909_v31 = vpack.c.bf16 %v809_v29, %v808_v28  ;;  %v2029_v28 = vld [vmem:[%s2807_s13 + $0x4] ss:$12 sps:$4 sm:$0xff]   ;;  %v2032_v29 = vld [vmem:[%s2807_s13 + $0x1c] ss:$12 sps:$4 sm:$0xff]  }
 0x1dd   :  { %v393_v34 = vmul.f32 %v384_v32, %v384_v32  ;;  %v392_v35 = vmul.f32 0.03125, %v391_v33 }
 0x1df   :  { %v394_v36 = vsub.f32 %v392_v35, %v393_v34  ;;  %v810_v34 = vld [vmem:[%s2805_s11 + $0xc0] sm:$0xff]  ;;  %v811_v35 = vld [vmem:[%s2805_s11 + $0xc8] sm:$0xff] }
 0x1e1   :  { %v396_v37 = vadd.f32 1e-05, %v394_v36  ;;  %v794_v36 = vld [vmem:[%s2805_s11 + $0x40] sm:$0xff] }
 0x1e3   :  { %2091 = vrsqrt.f32 %v396_v37  ;;  %v1913_v37 = vpack.c.bf16 %v811_v35, %v810_v34  ;;  %v2036_v34 = vld [vmem:[%s2807_s13 + $0x48] ss:$12 sps:$4 sm:$0xff]   ;;  %v2041_v35 = vld [vmem:[%s2807_s13 + $0x64] ss:$12 sps:$4 sm:$0xff]  }
 0x1ed   :  { %v2092_v39 = vpop.eup %2091 }
 0x1ee   :  { %v398_v40 = vmul.f32 %v2092_v39, %v395_v38  ;;  %v795_v38 = vld [vmem:[%s2805_s11 + $0x48] sm:$0xff] }
 0x1ef   :  { %v1915_v39 = vpack.c.bf16 %v795_v38, %v794_v36  ;;  %v2039_v36 = vld [vmem:[%s2807_s13 + $0x60] ss:$12 sps:$4 sm:$0xff]   ;;  %v2042_v38 = vld [vmem:[%s2807_s13 + $0x78] ss:$12 sps:$4 sm:$0xff]  }
 0x1f0   :  { %1642 = vmatmul.mubr.msk.f32.vlgmr.msra.gmra.mrb[2].mxu1 %vm406_vm5, %v398_v40  ;;  %v400_v43 = vmul.f32 %v398_v40, %v384_v32  ;;  %v793_v32 = vld [vmem:[%s2805_s11 + $0x38] sm:$0xff]  ;;  %v812_v40 = vld [vmem:[%s2805_s11 + $0xd0] sm:$0xff] }
 0x1f1   :  { %1896 = vmatpush1.bf16.msk.msra.mxu1 %vm2386_vm3, %v1888_v13  ;;  %555 = vmatprep.mubr.f32.mxu1 %v2122_v14  ;;  %v787_v13 = vld [vmem:[%s2805_s11 + $0x8] sm:$0xff]  ;;  %v1911_v33 = vpack.c.bf16 %v793_v32, %v792_v30  ;;  %v2030_v30 = vld [vmem:[%s2807_s13 + $0x18] ss:$12 sps:$4 sm:$0xff]   ;;  %v2033_v32 = vld [vmem:[%s2807_s13 + $0x30] ss:$12 sps:$4 sm:$0xff]  }
 0x1f2   :  { %v401_v45 = vsub.f32 %v399_v42, %v400_v43  ;;  %745 = vmatprep.subr.bf16.mxu1 %v1993_v41  ;;  %v2499_v17 = vpack.c.bf16 %v787_v13, %v786_v11  ;;  %v813_v41 = vld [vmem:[%s2805_s11 + $0xd8] sm:$0xff]  ;;  %v796_v42 = vld [vmem:[%s2805_s11 + $0x50] sm:$0xff]  ;;  %v610_v13 = vld [vmem:[%s2802_s8] sm:$0x3] }
 0x1f3   :  { %v1917_v43 = vpack.c.bf16 %v813_v41, %v812_v40  ;;  %v801_v11 = vld [vmem:[%s2805_s11 + $0x78] sm:$0xff]  ;;  %v615_v15 = vrot.slane %v610_v13, %v2355_v58  ;;  %v619_v16 = vrot.slane %v610_v13, %v2361_v60 }
 0x1f4   :  { %1645 = vmatmul.mubr.msk.f32.vlgmr.msra.gmra.mrb[4].mxu1 %vm406_vm5, %v401_v45  ;;  %1900 = vmatpush3.bf16.msra.mxu0 %v2499_v17  ;;  %v2045_v40 = vld [vmem:[%s2807_s13 + $0x90] ss:$12 sps:$4 sm:$0xff]   ;;  %v2050_v41 = vld [vmem:[%s2807_s13 + $0xac] ss:$12 sps:$4 sm:$0xff]  }
 0x1f5   :  { %746 = vmatpush1.bf16.msra.mxu1 %v1991_v44  ;;  %1902 = vmatprep.subr.bf16.mxu0 %v2501_v18  ;;  %v797_v44 = vld [vmem:[%s2805_s11 + $0x58] sm:$0xff] }
 0x1f6   :  { %747 = vmatprep.subr.bf16.mxu1 %v1996_v46  ;;  %v1919_v45 = vpack.c.bf16 %v797_v44, %v796_v42  ;;  %v814_v46 = vld [vmem:[%s2805_s11 + $0xe0] sm:$0xff]  ;;  %v2048_v42 = vld [vmem:[%s2807_s13 + $0xa8] ss:$12 sps:$4 sm:$0xff]  }
 0x1f7   :  { %v2051_v44 = vld [vmem:[%s2807_s13 + $0xc0] ss:$12 sps:$4 sm:$0xff]  }
 0x1f8   :  { %1904 = vmatpush3.bf16.msra.mxu0 %v1903_v21 }
 0x1f9   :  { %748 = vmatpush1.bf16.msra.mxu1 %v1994_v47  ;;  %1906 = vmatprep.subr.bf16.mxu0 %v1905_v25  ;;  %v815_v47 = vld [vmem:[%s2805_s11 + $0xe8] sm:$0xff] }
 0x1fa   :  { %749 = vmatprep.subr.bf16.mxu1 %v1999_v48  ;;  %v798_v48 = vld [vmem:[%s2805_s11 + $0x60] sm:$0xff] }
 0x1fc   :  { %1908 = vmatpush3.bf16.msra.mxu0 %v1907_v27 }
 0x1fd   :  { %750 = vmatpush1.bf16.msra.mxu1 %v1997_v49  ;;  %1910 = vmatprep.subr.bf16.mxu0 %v1909_v31  ;;  %v1921_v49 = vpack.c.bf16 %v815_v47, %v814_v46  ;;  %v2056_v46 = vld [vmem:[%s2807_s13 + $0xd8] ss:$12 sps:$4 sm:$0xff]   ;;  %v2063_v47 = vld [vmem:[%s2807_s13 + $0xf4] ss:$12 sps:$4 sm:$0xff]  }
 0x1fe   :  { %751 = vmatprep.subr.bf16.mxu1 %v2002_v50  ;;  %v799_v50 = vld [vmem:[%s2805_s11 + $0x68] sm:$0xff] }
 0x200   :  { %1912 = vmatpush3.bf16.msra.mxu0 %v1911_v33 }
 0x201   :  { %752 = vmatpush1.bf16.msra.mxu1 %v2000_v51  ;;  %1914 = vmatprep.subr.bf16.mxu0 %v1913_v37  ;;  %v1923_v51 = vpack.c.bf16 %v799_v50, %v798_v48  ;;  %v2061_v48 = vld [vmem:[%s2807_s13 + $0xf0] ss:$12 sps:$4 sm:$0xff]   ;;  %v2066_v50 = vld [vmem:[%s2807_s13 + $0x108] ss:$12 sps:$4 sm:$0xff]  }
 0x202   :  { %753 = vmatprep.subr.bf16.mxu1 %v2005_v52 }
 0x204   :  { %1916 = vmatpush3.bf16.msra.mxu0 %v1915_v39 }
 0x205   :  { %754 = vmatpush1.bf16.msra.mxu1 %v2003_v53  ;;  %1918 = vmatprep.subr.bf16.mxu0 %v1917_v43 }
 0x206   :  { %755 = vmatprep.subr.bf16.mxu1 %v2008_v54 }
 0x208   :  { %1920 = vmatpush3.bf16.msra.mxu0 %v1919_v45 }
 0x209   :  { %756 = vmatpush1.bf16.msra.mxu1 %v2006_v55  ;;  %1922 = vmatprep.subr.bf16.mxu0 %v1921_v49 }
 0x20a   :  { %757 = vmatprep.subr.bf16.mxu1 %v2011_v56 }
 0x20c   :  { %1924 = vmatpush3.bf16.msra.mxu0 %v1923_v51 }
 0x20d   :  { %758 = vmatpush1.bf16.msra.mxu1 %v2009_v59 }
 0x20e   :  { %759 = vmatprep.subr.bf16.mxu1 %v2014_v61 }
 0x211   :  { %760 = vmatpush1.bf16.msra.mxu1 %v2012_v62 }
 0x212   :  { %761 = vmatprep.subr.bf16.mxu1 %v2017_v63 }
 0x215   :  { %762 = vmatpush1.bf16.msra.mxu1 %v2015_v1 }
 0x216   :  { %763 = vmatprep.subr.bf16.mxu1 %v2020_v3 }
 0x219   :  { %764 = vmatpush1.bf16.msra.mxu1 %v2018_v4 }
 0x21a   :  { %765 = vmatprep.subr.bf16.mxu1 %v2023_v5 }
 0x21d   :  { %766 = vmatpush1.bf16.msra.mxu1 %v2021_v6 }
 0x21e   :  { %767 = vmatprep.subr.bf16.mxu1 %v2026_v7 }
 0x221   :  { %768 = vmatpush1.bf16.msra.mxu1 %v2024_v8 }
 0x222   :  { %1930 = vmatprep.subr.bf16.mxu1 %v1897_v12  ;;  %v1927_v12 = vpack.c.bf16 %v801_v11, %v800_v10 }
 0x2c3   :  { %v483_v52 = vpop.f32.mrb[2].mxu1 }
 0x2c4   :  { %v565_v53 = vrot.slane %v483_v52, %v2355_v58  ;;  %v485_v54 = vpop.f32.mrb[3].mxu1  ;;  %v2071_v52 = vld [vmem:[%s2807_s13 + $0x120] ss:$12 sps:$4 sm:$0xff]  }
 0x2c5   :  { %v569_v55 = vrot.slane %v485_v54, %v2355_v58 }
 0x2c6   :  { %v570_v59 = vmul.f32 %v565_v53, %v2365_v0  ;;  %v816_v0 = vld [vmem:[%s2805_s11 + $0xf0] sm:$0xff] }
 0x2c7   :  { %v557_v56 = vpop.f32.mrb[4].mxu1  ;;  %v571_v63 = vmul.f32 %v569_v55, %v2367_v2  ;;  %v817_v2 = vld [vmem:[%s2805_s11 + $0xf8] sm:$0xff] }
 0x2c8   :  { %v575_v61 = vrot.slane %v557_v56, %v2355_v58  ;;  %v559_v62 = vpop.f32.mrb[5].mxu1  ;;  %v1925_v9 = vpack.c.bf16 %v817_v2, %v816_v0 }
 0x2c9   :  { %v579_v1 = vrot.slane %v559_v62, %v2355_v58 }
 0x2ca   :  { %v580_v3 = vadd.f32 %v575_v61, %v570_v59  ;;  %1926 = vmatprep.subr.bf16.mxu0 %v1925_v9 }
 0x2cb   :  { %v581_v4 = vadd.f32 %v579_v1, %v571_v63  ;;  %1928 = vmatpush3.bf16.msra.mxu0 %v1927_v12 }
 0x2cc   :  { %v582_v5 = vmax.f32 %v580_v3, 0.0  ;;  %1498 = vmatprep.subr.bf16.mxu0 %v2029_v28 }
 0x2cd   :  { %v583_v6 = vmax.f32 %v581_v4, 0.0 }
 0x2ce   :  { %v584_v8 = vpack.c.bf16 %v582_v5, %v582_v5 }
 0x2cf   :  { %v585_v7 = vpack.c.bf16 %v583_v6, %v583_v6 }
 0x2d1   :  { %1670 = vmatprep.mubr.msk.bf16.mxu1 %vm227_vm0, %v585_v7 }
 0x2d2   :  { %778 = vmatmul.mubr.bf16.vlgmr.msra.gmra.mrb[8].mxu1 %v584_v8 }
 0x2d3   :  { %1932 = vmatpush3.bf16.msra.mxu1 %v2499_v17 }
 0x2d4   :  { %1934 = vmatprep.subr.bf16.mxu1 %v2501_v18 }
 0x2d7   :  { %1936 = vmatpush3.bf16.msra.mxu1 %v1903_v21 }
 0x2d8   :  { %1938 = vmatprep.subr.bf16.mxu1 %v1905_v25  ;;  %v987_v25 = vld [vmem:[%s2806_s12 + $0x8] sm:$0xff] }
 0x2db   :  { %1940 = vmatpush3.bf16.msra.mxu1 %v1907_v27  ;;  %v2027_v27 = vld [vmem:[%s2807_s13] ss:$12 sps:$4 sm:$0xff]  }
 0x2dc   :  { %1942 = vmatprep.subr.bf16.mxu1 %v1909_v31  ;;  %v2035_v31 = vld [vmem:[%s2807_s13 + $0x34] ss:$12 sps:$4 sm:$0xff]  }
 0x2df   :  { %1944 = vmatpush3.bf16.msra.mxu1 %v1911_v33  ;;  %v2038_v33 = vld [vmem:[%s2807_s13 + $0x4c] ss:$12 sps:$4 sm:$0xff]  }
 0x2e0   :  { %1946 = vmatprep.subr.bf16.mxu1 %v1913_v37  ;;  %v2044_v37 = vld [vmem:[%s2807_s13 + $0x7c] ss:$12 sps:$4 sm:$0xff]  }
 0x2e3   :  { %1948 = vmatpush3.bf16.msra.mxu1 %v1915_v39  ;;  %v2047_v39 = vld [vmem:[%s2807_s13 + $0x94] ss:$12 sps:$4 sm:$0xff]  }
 0x2e4   :  { %1950 = vmatprep.subr.bf16.mxu1 %v1917_v43  ;;  %v2053_v43 = vld [vmem:[%s2807_s13 + $0xc4] ss:$12 sps:$4 sm:$0xff]  }
 0x2e7   :  { %1952 = vmatpush3.bf16.msra.mxu1 %v1919_v45  ;;  %v2058_v45 = vld [vmem:[%s2807_s13 + $0xdc] ss:$12 sps:$4 sm:$0xff]  }
 0x2e8   :  { %1954 = vmatprep.subr.bf16.mxu1 %v1921_v49  ;;  %v2068_v49 = vld [vmem:[%s2807_s13 + $0x10c] ss:$12 sps:$4 sm:$0xff]  }
 0x2eb   :  { %1956 = vmatpush3.bf16.msra.mxu1 %v1923_v51  ;;  %v2073_v51 = vld [vmem:[%s2807_s13 + $0x124] ss:$12 sps:$4 sm:$0xff]  }
 0x2ec   :  { %1958 = vmatprep.subr.bf16.mxu1 %v1925_v9 }
 0x2ef   :  { %1960 = vmatpush3.bf16.msra.mxu1 %v1927_v12 }
 0x2f0   :  { %992 = vmatprep.subr.mxu1 %v987_v25 }
 0x3a5   :  { %v779_v17 = vpop.f32.mrb[8].mxu1 }
 0x3a6   :  { %v2597_v18 = vadd.f32 %v779_v17, %v615_v15  ;;  %v781_v19 = vpop.f32.mrb[9].mxu1 }
 0x3a7   :  { %v2599_v20 = vadd.f32 %v781_v19, %v619_v16  ;;  %v783_v21 = vpop.f32.mrb[10].mxu1  ;;  %v979_v19 = vld [vmem:[%s2803_s9] sm:$0x1] }
 0x3a8   :  { %v784_v22 = vpop.f32.mrb[11].mxu1  ;;  %v888_v24 = vmul.f32 %v2597_v18, %v2597_v18 }
 0x3a9   :  { %882 = vmatprep.mubr.f32.mxu0 %v2599_v20  ;;  %v889_v23 = vmul.f32 %v2599_v20, %v2599_v20 }
 0x3aa   :  { %883 = vmatmul.mubr.f32.vlgmr.msra.gmra.mrb[6].mxu0 %v2597_v18 }
 0x3ab   :  { %954 = vmatprep.mubr.f32.mxu1 %v889_v23  ;;  %1499 = vmatpush1.bf16.msra.mxu0 %v2027_v27  ;;  %v2054_v23 = vld [vmem:[%s2807_s13 + $0xc8] ss:$12 sps:$4 sm:$0xff]  }
 0x3ac   :  { %955 = vmatmul.mubr.f32.vlgmr.msra.gmra.mrb[6].mxu1 %v888_v24  ;;  %1500 = vmatprep.subr.bf16.mxu0 %v2032_v29  ;;  %v983_v24 = vld [vmem:[%s2804_s10] sm:$0x1]  ;;  %v2055_v27 = vld [vmem:[%s2807_s13 + $0x8] ss:$12 sps:$4 sm:$0xff]  }
 0x3ad   :  { %1056 = vmatprep.mubr.f32.mxu1 %v2122_v14  ;;  %993 = vmatpush1.msra.mxu1 %v2614_v26  ;;  %v2059_v29 = vld [vmem:[%s2807_s13 + $0xe0] ss:$12 sps:$4 sm:$0xff]  }
 0x3ae   :  { %1066 = vmatprep.subr.mxu1 %v987_v25 }
 0x3af   :  { %1501 = vmatpush1.bf16.msra.mxu0 %v2030_v30  ;;  %v2060_v30 = vld [vmem:[%s2807_s13 + $0x20] ss:$12 sps:$4 sm:$0xff]  }
 0x3b0   :  { %1502 = vmatprep.subr.bf16.mxu0 %v2035_v31  ;;  %v2069_v31 = vld [vmem:[%s2807_s13 + $0x110] ss:$12 sps:$4 sm:$0xff]  }
 0x3b3   :  { %1503 = vmatpush1.bf16.msra.mxu0 %v2033_v32  ;;  %v2070_v32 = vld [vmem:[%s2807_s13 + $0x50] ss:$12 sps:$4 sm:$0xff]  }
 0x3b4   :  { %1504 = vmatprep.subr.bf16.mxu0 %v2038_v33  ;;  %v2074_v33 = vld [vmem:[%s2807_s13 + $0x128] ss:$12 sps:$4 sm:$0xff]  }
 0x3b7   :  { %1505 = vmatpush1.bf16.msra.mxu0 %v2036_v34  ;;  %v2075_v34 = vld [vmem:[%s2807_s13 + $0x68] ss:$12 sps:$4 sm:$0xff]  }
 0x3b8   :  { %1506 = vmatprep.subr.bf16.mxu0 %v2041_v35  ;;  %v2078_v35 = vld [vmem:[%s2807_s13 + $0x13c] ss:$12 sps:$4 sm:$0xff]  }
 0x3bb   :  { %1507 = vmatpush1.bf16.msra.mxu0 %v2039_v36  ;;  %v2079_v36 = vld [vmem:[%s2807_s13 + $0x140] ss:$12 sps:$4 sm:$0xff]  }
 0x3bc   :  { %1508 = vmatprep.subr.bf16.mxu0 %v2044_v37  ;;  %v2076_v37 = vld [vmem:[%s2807_s13 + $0x138] ss:$12 sps:$4 sm:$0xff]  }
 0x3bf   :  { %1509 = vmatpush1.bf16.msra.mxu0 %v2042_v38  ;;  %v2080_v38 = vld [vmem:[%s2807_s13 + $0x80] ss:$12 sps:$4 sm:$0xff]  }
 0x3c0   :  { %1510 = vmatprep.subr.bf16.mxu0 %v2047_v39  ;;  %v2083_v39 = vld [vmem:[%s2807_s13 + $0x154] ss:$12 sps:$4 sm:$0xff]  }
 0x3c3   :  { %1511 = vmatpush1.bf16.msra.mxu0 %v2045_v40  ;;  %v2084_v40 = vld [vmem:[%s2807_s13 + $0x158] ss:$12 sps:$4 sm:$0xff]  }
 0x3c4   :  { %1512 = vmatprep.subr.bf16.mxu0 %v2050_v41  ;;  %v2081_v41 = vld [vmem:[%s2807_s13 + $0x150] ss:$12 sps:$4 sm:$0xff]  }
 0x3c7   :  { %1513 = vmatpush1.bf16.msra.mxu0 %v2048_v42  ;;  %v2085_v42 = vld [vmem:[%s2807_s13 + $0x98] ss:$12 sps:$4 sm:$0xff]  }
 0x3c8   :  { %1514 = vmatprep.subr.bf16.mxu0 %v2053_v43  ;;  %v2088_v43 = vld [vmem:[%s2807_s13 + $0x16c] ss:$12 sps:$4 sm:$0xff]  }
 0x3cb   :  { %1515 = vmatpush1.bf16.msra.mxu0 %v2051_v44  ;;  %v2089_v44 = vld [vmem:[%s2807_s13 + $0x170] ss:$12 sps:$4 sm:$0xff]  }
 0x3cc   :  { %1516 = vmatprep.subr.bf16.mxu0 %v2058_v45  ;;  %v2086_v45 = vld [vmem:[%s2807_s13 + $0x168] ss:$12 sps:$4 sm:$0xff]  }
 0x3cf   :  { %1517 = vmatpush1.bf16.msra.mxu0 %v2056_v46  ;;  %v2090_v46 = vld [vmem:[%s2807_s13 + $0xb0] ss:$12 sps:$4 sm:$0xff]  }
 0x3d0   :  { %1518 = vmatprep.subr.bf16.mxu0 %v2063_v47 }
 0x3d3   :  { %1519 = vmatpush1.bf16.msra.mxu0 %v2061_v48 }
 0x3d4   :  { %1520 = vmatprep.subr.bf16.mxu0 %v2068_v49 }
 0x3d7   :  { %1521 = vmatpush1.bf16.msra.mxu0 %v2066_v50 }
 0x3d8   :  { %1522 = vmatprep.subr.bf16.mxu0 %v2073_v51 }
 0x3db   :  { %1523 = vmatpush1.bf16.msra.mxu0 %v2071_v52 }
 0x3dc   :  { %1524 = vmatprep.subr.bf16.mxu0 %v2078_v35 }
 0x3df   :  { %1525 = vmatpush1.bf16.msra.mxu0 %v2076_v37 }
 0x3e0   :  { %1526 = vmatprep.subr.bf16.mxu0 %v2083_v39 }
 0x3e3   :  { %1527 = vmatpush1.bf16.msra.mxu0 %v2081_v41 }
 0x3e4   :  { %1528 = vmatprep.subr.bf16.mxu0 %v2088_v43 }
 0x3e7   :  { %1529 = vmatpush1.bf16.msra.mxu0 %v2086_v45 }
 0x47d   :  { %v1753_v53 = vpop.f32.mrb[6].mxu0 }
 0x47e   :  { %v1754_v54 = vpop.f32.mrb[7].mxu0 }
 0x47f   :  { %v1755_v55 = vadd.f32 %v1754_v54, %v1753_v53  ;;  %v1788_v56 = vpop.f32.mrb[6].mxu1 }
 0x480   :  { %v1789_v59 = vpop.f32.mrb[7].mxu1 }
 0x481   :  { %v961_v61 = vsel %vm960_vm6, %v1755_v55, 0.0  ;;  %v1790_v62 = vadd.f32 %v1789_v59, %v1788_v56 }
 0x482   :  { %v962_v63 = vrot.slane %v961_v61, 4 }
 0x483   :  { %v969_v1 = vsel %vm960_vm6, %v1790_v62, 0.0 }
 0x484   :  { %v963_v3 = vadd.f32 %v962_v63, %v961_v61  ;;  %v970_v4 = vrot.slane %v969_v1, 4 }
 0x486   :  { %v964_v5 = vrot.slane %v963_v3, 2  ;;  %v971_v6 = vadd.f32 %v970_v4, %v969_v1  ;;  %v2123_v4 = vmov 1983009808  }
 0x488   :  { %v965_v7 = vadd.f32 %v964_v5, %v963_v3  ;;  %v972_v8 = vrot.slane %v971_v6, 2  ;;  %v1587_v5 = vunpack.c.l.s4 %v2123_v4 }
 0x48a   :  { %v966_v0 = vrot.slane %v965_v7, 1  ;;  %v973_v2 = vadd.f32 %v972_v8, %v971_v6 }
 0x48c   :  { %v967_v9 = vadd.f32 %v966_v0, %v965_v7  ;;  %v974_v10 = vrot.slane %v973_v2, 1 }
 0x48e   :  { %v968_v11 = vmul.f32 0.015625, %v967_v9  ;;  %v975_v12 = vadd.f32 %v974_v10, %v973_v2  ;;  %v1588_v2 = vunpack.c.0.s8 %v1587_v5 }
 0x490   :  { %v977_v13 = vmul.f32 %v968_v11, %v968_v11  ;;  %v976_v15 = vmul.f32 0.015625, %v975_v12 }
 0x492   :  { %v978_v16 = vsub.f32 %v976_v15, %v977_v13 }
 0x494   :  { %v980_v17 = vadd.f32 1e-05, %v978_v16 }
 0x496   :  { %2093 = vrsqrt.f32 %v980_v17 }
 0x4a0   :  { %v2094_v21 = vpop.eup %2093 }
 0x4a1   :  { %v982_v22 = vmul.f32 %v2094_v21, %v979_v19 }
 0x4a3   :  { %1671 = vmatmul.mubr.msk.f32.vlgmr.msra.gmra.mrb[12].mxu1 %vm988_vm7, %v982_v22  ;;  %v984_v25 = vmul.f32 %v982_v22, %v968_v11 }
 0x4a4   :  { %1067 = vmatpush1.msra.mxu1 %v2614_v26  ;;  %1130 = vmatprep.mubr.f32.mxu1 %v2122_v14  ;;  %v2064_v14 = vld [vmem:[%s2807_s13 + $0xf8] ss:$12 sps:$4 sm:$0xff]  }
 0x4a5   :  { %v985_v28 = vsub.f32 %v983_v24, %v984_v25  ;;  %1791 = vmatprep.subr.bf16.mxu1 %v2054_v23  ;;  %v2065_v26 = vld [vmem:[%s2807_s13 + $0x38] ss:$12 sps:$4 sm:$0xff]  }
 0x4a7   :  { %1672 = vmatmul.mubr.msk.f32.vlgmr.msra.gmra.mrb[14].mxu1 %vm988_vm7, %v985_v28 }
 0x4a8   :  { %1792 = vmatpush3.bf16.msra.mxu1 %v2055_v27 }
 0x4a9   :  { %1793 = vmatprep.subr.bf16.mxu1 %v2059_v29 }
 0x4ac   :  { %1794 = vmatpush3.bf16.msra.mxu1 %v2060_v30 }
 0x4ad   :  { %1795 = vmatprep.subr.bf16.mxu1 %v2064_v14 }
 0x4b0   :  { %1796 = vmatpush3.bf16.msra.mxu1 %v2065_v26 }
 0x4b1   :  { %1797 = vmatprep.subr.bf16.mxu1 %v2069_v31 }
 0x4b4   :  { %1798 = vmatpush3.bf16.msra.mxu1 %v2070_v32 }
 0x4b5   :  { %1799 = vmatprep.subr.bf16.mxu1 %v2074_v33 }
 0x4b8   :  { %1800 = vmatpush3.bf16.msra.mxu1 %v2075_v34 }
 0x4b9   :  { %1801 = vmatprep.subr.bf16.mxu1 %v2079_v36 }
 0x4bc   :  { %1802 = vmatpush3.bf16.msra.mxu1 %v2080_v38 }
 0x4bd   :  { %1803 = vmatprep.subr.bf16.mxu1 %v2084_v40 }
 0x4c0   :  { %1804 = vmatpush3.bf16.msra.mxu1 %v2085_v42 }
 0x4c1   :  { %1805 = vmatprep.subr.bf16.mxu1 %v2089_v44 }
 0x4c4   :  { %1806 = vmatpush3.bf16.msra.mxu1 %v2090_v46 }
 0x576   :  { %v1058_v47 = vpop.f32.mrb[12].mxu1 }
 0x577   :  { %v1140_v48 = vrot.slane %v1058_v47, %v2355_v58  ;;  %v1060_v49 = vpop.f32.mrb[13].mxu1 }
 0x578   :  { %v1144_v50 = vrot.slane %v1060_v49, %v2355_v58 }
 0x579   :  { %v1145_v52 = vmul.f32 %v1140_v48, %v2597_v18  ;;  %v1225_v18 = vld [vmem:[%s2808_s14] sm:$0x7]  ;;  %s2124_s14 = smov [#allocation2]  }
 0x57a   :  { %v1132_v51 = vpop.f32.mrb[14].mxu1  ;;  %v1146_v55 = vmul.f32 %v1144_v50, %v2599_v20  ;;  %v1237_v20 = vsub.s32 2, %v2352_v57  ;;  %v1230_v6 = vrot.slane %v1225_v18, %v2355_v58  ;;  %v1234_v7 = vrot.slane %v1225_v18, %v2361_v60  ;;  %s1614_s30 = sshll.u32 %s2124_s14, 4  ;;  %s1615_s30 = int_to_ptr.vmem [resolvable:$true] %s1614_s30 }
 0x57b   :  { %v1150_v53 = vrot.slane %v1132_v51, %v2355_v58  ;;  %v1134_v54 = vpop.f32.mrb[15].mxu1  ;;  %s2095_s16 = scalar_lea.vmem %s1615_s30, 96  ;;  %p2100_p1 = scmp.lt.s32.totalorder %s1615_s30, %s1615_s30 }
 0x57c   :  { %v1154_v56 = vrot.slane %v1134_v54, %v2355_v58  ;;  %v1238_v9 = vrot.slane %v1225_v18, %v1237_v20  ;;  %v1591_v58 = vsub.s32 %v1588_v2, %v2352_v57  ;;  %p2096_p0 = scmp.ne.s32.totalorder %s1615_s30, %s2095_s16  ;;  %p2101_p2 = scmp.lt.s32.totalorder %s2095_s16, %s2095_s16 }
 0x57d   :  { %v1155_v59 = vadd.f32 %v1150_v53, %v1145_v52 }
 0x57e   :  { %v1156_v61 = vadd.f32 %v1154_v56, %v1146_v55  ;;  %p2102_p3 = por %p2101_p2, %p2100_p1 }
 0x57f   :  { %v1157_v62 = vmax.f32 %v1155_v59, 0.0 }
 0x580   :  { %v1158_v63 = vmax.f32 %v1156_v61, 0.0  ;;  %p2103_p4 = pnand %p2102_p3, %p2096_p0 }
 0x581   :  { %v1159_v3 = vpack.c.bf16 %v1157_v62, %v1157_v62 }
 0x582   :  { %v1160_v1 = vpack.c.bf16 %v1158_v63, %v1158_v63 }
 0x584   :  { %1530 = vmatprep.mubr.bf16.mxu0 %v1160_v1  ;;  %1571 = vmatprep.mubr.bf16.mxu1 %v1160_v1 }
 0x585   :  { %1531 = vmatmul.mubr.bf16.vlgmr.msra.gmra.mrb[8].mxu0 %v1159_v3  ;;  %1572 = vmatmul.mubr.bf16.vlgmr.msra.gmra.mrb[16].mxu1 %v1159_v3 }
 0x658   :  { %v1532_v8 = vpop.f32.mrb[8].mxu0  ;;  %v1807_v0 = vpop.f32.mrb[16].mxu1 }
 0x659   :  { %v1533_v10 = vadd.f32 %v1532_v8, %v1230_v6  ;;  %v1534_v11 = vpop.f32.mrb[9].mxu0  ;;  %v1808_v12 = vpop.f32.mrb[17].mxu1 }
 0x65a   :  { %v1535_v13 = vadd.f32 %v1534_v11, %v1234_v7  ;;  %v1809_v15 = vadd.f32 %v1808_v12, %v1807_v0  ;;  %v1536_v16 = vpop.f32.mrb[10].mxu0  ;;  %v1810_v17 = vpop.f32.mrb[18].mxu1 }
 0x65b   :  { %v1579_v19 = vmax.f32 %v1533_v10, 0.0  ;;  %v1537_v21 = vpop.f32.mrb[11].mxu0  ;;  %v1811_v22 = vpop.f32.mrb[19].mxu1 }
 0x65c   :  { %v1580_v23 = vmax.f32 %v1535_v13, 0.0  ;;  %v1574_v60 = vadd.f32 %v1809_v15, %v1238_v9 }
 0x65e   :  { %v1585_v24 = vcombine.low %v1579_v19, %v1580_v23  ;;  %v1581_v25 = vmax.f32 %v1574_v60, 0.0 }
 0x660   :  { %v1592_v27 = vrot.slane %v1585_v24, %v1591_v58  ;;  %v1599_v28 = vrot.slane %v1581_v25, %v1591_v58 }
 0x662   :  { %v1600_v29 = vcombine.low %v1592_v27, %v1599_v28 }
 0x664   :  { %1607 = vst.msk [vmem:[#allocation2] sm:$0x3f] %vm1606_vm12, %v1600_v29 }
 0x665   :  { %2106 = shalt.err (!%p2103_p4)
}
 0x666   :  { %s2107_s11 = scalar_lea.hbm %s2809_s15, 96 }
 0x667   :  { %p2108_p5 = scmp.ne.s32.totalorder %s2809_s15, %s2107_s11  ;;  %p2111_p6 = scmp.lt.u32.totalorder %s2107_s11, %s2809_s15 }
 0x669   :  { %p2113_p7 = pnand %p2111_p6, %p2108_p5 }
 0x66b   :  { %2116 = shalt.err (!%p2113_p7)
}
 0x66c   :  { %1617 = dma.vmem_to_hbm [thread:$0]  %s1615_s30, 96, %s2809_s15, [#allocation3]  }
 0x66d   :  { %2117 = dma.done.wait [#allocation3], 96  }
 0x66e   :  { %2118 = vsyncadd [#allocation3], 4294967200 }
 0x66f   :  { %1621 = vsyncpa [#allocation3], 1 }

</bundles_post_ra>
